<compile_context>
chip_gen: v7x
topology: tpu7x:2x2x1
jax: 0.10.0
libtpu: 0.0.40
codegen_flags: <defaults>
</compile_context>

<pallas_src>
import jax
import jax.numpy as jnp
from jax import lax
from jax.experimental import pallas as pl
from jax.experimental.pallas import tpu as pltpu


# ----------------------------- config -----------------------------
NUM_POINTS = 8           # n_offsets; n_strips = num_points - 1
MAX_LANES = 4
IMG_H = 32
IMG_W = 64
IGNORE_LABEL = 255       # unused: reference builds FocalLoss(..., ignore=False)

S = 3                    # refine_layers
P = 16                   # priors per image
B = 1                    # images per batch (reference stage-indexing implies 1)
D = 6 + NUM_POINTS       # 2 cls logits + (start_y, start_x, theta, length) + n_offsets
L = MAX_LANES
G = 2 * S                # both branches stacked: g = 0..2 branch A, 3..5 branch B

CLS_W = 2.5
YXT_W = 0.5
IOU_W = 2.0
FOCAL_ALPHA = (0.1, 0.9)   # gamma = 2.0 implemented as an explicit square
LIOU_LENGTH = 15.0

N_STRIPS = float(NUM_POINTS - 1)
IMG_W_M1 = float(IMG_W - 1)
INV_DEN = 1.0 / float(B * S)         # total_loss /= len(targets) * refine_layers

GP = G * P                           # 96 used lanes
LANES = 128                          # padded lane width (full vreg)
A_LANES = S * P                      # 48: lanes belonging to branch A
K_MED = (P - 1) // 2                 # 7: torch.median -> lower of two middle values
OVR_C = 2.0 * LIOU_LENGTH * NUM_POINTS   # 240

# slab row indices (R = 32 rows total -> exactly 4 (8,128) tiles)
R_PO = 0        # 0..7   pred offsets (normalized)          -- tile-aligned (8,128)
R_TO = 8        # 8..15  matched target offsets (pixels)    -- tile-aligned (8,128)
R_L0 = 16       # cls logit 0
R_L1 = 17       # cls logit 1
R_PY = 18       # 18..21 pred  start_y, start_x, theta, length (normalized)
R_TY = 22       # 22..25 target start_y, start_x, theta, length (normalized)
R_MASK = 26     # matched-prior mask (0/1)
R_REGW = 27     # mask / len(matched_row_inds)
R_W = 28        # final weights: (1-dw_p) on branch-A lanes, dw_p on branch-B lanes
R_Q = 29        # (2*dw_p - 1) at lanes 0..15, 0 elsewhere
R_TOTAL = 32


def _smooth_l1(a, b):
    d = jnp.abs(a - b)
    return jnp.where(d < 1.0, 0.5 * d * d, d - 0.5)


def _tree_sum(xs):
    xs = list(xs)
    while len(xs) > 1:
        nxt = [xs[i] + xs[i + 1] for i in range(0, len(xs) - 1, 2)]
        if len(xs) % 2:
            nxt.append(xs[-1])
        xs = nxt
    return xs[0]


# ----------------------------- fused kernel -----------------------------
def _fused_kernel(slab_ref, out_ref):
    """Lane layout: lane = g*P + p (g: 0..2 branch A stages, 3..5 branch B stages,
    p: prior 0..15). Lanes 96..127 are zero padding; they never reach the outputs
    because the w/sign/q rows are zero there."""
    f32 = jnp.float32

    # ---- focal classification loss (softmax, alpha=[0.1,0.9], gamma=2) ----
    # TODO(synk): FocalLoss is external to the module; standard softmax focal loss used.
    l0 = slab_ref[R_L0:R_L0 + 1, :]
    l1 = slab_ref[R_L1:R_L1 + 1, :]
    pos = slab_ref[R_MASK:R_MASK + 1, :] > 0.5
    m = jnp.maximum(l0, l1)
    logz = m + jnp.log(jnp.exp(l0 - m) + jnp.exp(l1 - m))
    logpt = jnp.where(pos, l1, l0) - logz
    pt = jnp.exp(logpt)
    alpha_t = jnp.where(pos, FOCAL_ALPHA[1], FOCAL_ALPHA[0])
    omp = 1.0 - pt
    cls_loss = -alpha_t * omp * omp * logpt                              # (1, 128)

    # ---- smooth-L1 on (start_y, start_x, theta, length) ----
    p_sy = slab_ref[R_PY + 0:R_PY + 1, :]
    p_sx = slab_ref[R_PY + 1:R_PY + 2, :]
    p_th = slab_ref[R_PY + 2:R_PY + 3, :]
    p_ln = slab_ref[R_PY + 3:R_PY + 4, :]
    t_sy = slab_ref[R_TY + 0:R_TY + 1, :]
    t_sx = slab_ref[R_TY + 1:R_TY + 2, :]
    t_th = slab_ref[R_TY + 2:R_TY + 3, :]
    t_ln = slab_ref[R_TY + 3:R_TY + 4, :]

    ry = p_sy * N_STRIPS
    rx = p_sx * IMG_W_M1
    rt = p_th * 180.0
    rl = p_ln * N_STRIPS
    # length adjustment (no_grad in the reference; forward-only here)
    ps = jnp.clip(jnp.round(p_sy * N_STRIPS), 0.0, N_STRIPS)
    tsr = jnp.round(t_sy * N_STRIPS)
    adj = ps - tsr
    ty = t_sy * N_STRIPS
    tx = t_sx * IMG_W_M1
    tt = t_th * 180.0
    tl = (t_ln - adj) * N_STRIPS            # (target - adj) scaled, matches reference order
    yxtl = (_smooth_l1(ry, ty) + _smooth_l1(rx, tx)
            + _smooth_l1(rt, tt) + _smooth_l1(rl, tl)) * 0.25            # .mean(-1)

    # ---- line-IoU (length = 15 px), offsets on sublanes ----
    # TODO(synk): liou_loss_diff is external; standard CLRNet line-IoU used.
    # per-point ovr = min-max+2L, union = max-min+2L  =>  only one sublane reduction.
    po = slab_ref[R_PO:R_PO + NUM_POINTS, :] * IMG_W_M1                  # (8, 128)
    to = slab_ref[R_TO:R_TO + NUM_POINTS, :]                             # (8, 128)
    mn = jnp.minimum(po, to)
    mx = jnp.maximum(po, to)
    a = jnp.sum(mn - mx, axis=0, keepdims=True)                          # (1, 128)
    sum_ovr = a + OVR_C
    sum_uni = OVR_C - a
    liou = 1.0 - sum_ovr * pl.reciprocal(sum_uni + 1e-9, approx=False)

    # ---- per-(g,p) total ----  (NaN-proof: mask before the regw multiply)
    regw = slab_ref[R_REGW:R_REGW + 1, :]
    reg_terms = jnp.where(pos, yxtl * YXT_W + liou * IOU_W, 0.0)
    total = (cls_loss * CLS_W + regw * reg_terms) * INV_DEN              # (1, 128)

    # ---- base weighted sum (decoupled from delta) ----
    w = slab_ref[R_W:R_W + 1, :]
    q = slab_ref[R_Q:R_Q + 1, :]
    base = jnp.sum(w * total, axis=1, keepdims=True)                     # (1, 1)
    qs = jnp.sum(q, axis=1, keepdims=True)                               # (1, 1) = sum(2dw-1)

    # ---- per-prior diff = loss_A - loss_B, 16-periodic over the 128 lanes ----
    lane = lax.broadcasted_iota(jnp.int32, (1, LANES), 1)
    sign = jnp.where(lane < A_LANES, 1.0, jnp.where(lane < GP, -1.0, 0.0))
    st = total * sign
    # Full-circle group sum with shifts {64, 32, 16}: f[i] = sum_g sign_g * total[g, i%16]
    # (roll-direction agnostic because the offset set is closed under negation mod 128).
    f = st + pltpu.roll(st, 64, axis=1)
    f = f + pltpu.roll(f, 32, axis=1)
    f = f + pltpu.roll(f, 16, axis=1)

    # ---- torch.median (lower median) via rank selection ----
    # element value v is the K_MED-th order statistic  iff  c_lt(v) <= K_MED <= c_lt+cnt-1,
    # i.e. (c_lt <= K_MED) & (c_le >= K_MED).  All selected lanes hold the same value.
    lts, les = [], []
    for k in range(1, P):                       # 15 independent lane rotations (XLU)
        r = pltpu.roll(f, k, axis=1)
        lts.append((r < f).astype(f32))
        les.append((r <= f).astype(f32))
    c_lt = _tree_sum(lts)
    c_le = _tree_sum(les)
    is_med = (c_lt <= float(K_MED)) & (c_le >= float(K_MED))
    delta = jnp.max(jnp.where(is_med, f, f32(-3.0e38)), axis=1, keepdims=True)   # (1, 1)

    # out = sum((1-dw)*(loss_A - d/2) + dw*(loss_B + d/2)) = base + d/2 * sum(2dw-1)
    out_ref[...] = base + 0.5 * delta * qs


def fused_loss(slab):
    out = pl.pallas_call(
        _fused_kernel,
        out_shape=jax.ShapeDtypeStruct((1, 1), jnp.float32),
        in_specs=[pl.BlockSpec(memory_space=pltpu.MemorySpace.VMEM)],
        out_specs=pl.BlockSpec(memory_space=pltpu.MemorySpace.VMEM),
    )(slab)
    return out[0, 0]


# ----------------------------- assignment glue (no_grad) -----------------------------
def _greedy_assign_one(pred_xs, tgt_xs, valid):
    """Deterministic greedy min-cost one-to-one prior<->target assignment.

    TODO(synk): the reference anc_assign (dynamic-k / Hungarian-style anchor assignment)
    is external and produces variable-length index lists; a greedy one-to-one assignment
    over the static max_lanes slots is used instead.  Rows of invalid targets are zero.
    """
    n_priors = pred_xs.shape[0]
    n_lanes = tgt_xs.shape[0]
    cost = jnp.mean(jnp.abs(pred_xs[:, None, :] - tgt_xs[None, :, :]), axis=-1)   # [P, L]
    prior_ids = jnp.arange(n_priors)

    def body(l, carry):
        used, onehot = carry
        c = jnp.where(used, jnp.inf, cost[:, l])
        p_idx = jnp.argmin(c)
        row = jnp.where(valid[l], (prior_ids == p_idx).astype(jnp.float32), 0.0)
        onehot = onehot.at[l].set(row)
        used = used | ((prior_ids == p_idx) & valid[l])
        return used, onehot

    used0 = jnp.zeros((n_priors,), bool)
    oh0 = jnp.zeros((n_lanes, n_priors), jnp.float32)
    _, oh = jax.lax.fori_loop(0, n_lanes, body, (used0, oh0))
    return oh                                                                      # [L, P]


# ----------------------------- forward -----------------------------
@jax.jit
def _forward_impl(preds_a, preds_b, gt_lane, diff_arr):
    target = gt_lane[0]                                        # [L, D]
    valid = target[:, 1] == 1.0
    tgt_xs = target[:, 6:]                                     # pixels (as in reference)

    preds_all = jnp.concatenate([preds_a, preds_b], axis=0)    # [G, P, D]
    pred_xs = preds_all[:, :, 6:] * IMG_W_M1                   # [G, P, n_offsets]

    oh = jax.vmap(_greedy_assign_one, in_axes=(0, None, None))(pred_xs, tgt_xs, valid)
    oh = jax.lax.stop_gradient(oh)                             # [G, L, P]

    mask = jnp.sum(oh, axis=1)                                 # [G, P]  matched-prior mask
    nm = jnp.sum(mask, axis=1, keepdims=True)                  # [G, 1]  len(matched_row_inds)
    inv_m = jnp.where(nm > 0.0, 1.0 / jnp.maximum(nm, 1.0), 0.0)
    regw = mask * inv_m                                        # [G, P]

    # Per-prior matched targets (targets carry no gradient; gather stays in glue).
    tgt_m = jnp.einsum('glp,ld->gpd', oh, target)              # [G, P, D]

    # lane-dense feature-major rows: value at lane g*P + p
    preds_rows = jnp.transpose(preds_all, (2, 0, 1)).reshape(D, GP)   # [D, 96]
    tgts_rows = jnp.transpose(tgt_m, (2, 0, 1)).reshape(D, GP)        # [D, 96]

    # diffOneFrame = stack(diff).squeeze().mean(dim=0)
    dw = jnp.mean(jnp.squeeze(diff_arr), axis=0)               # [P]
    gsel = (jnp.arange(G) < S).astype(jnp.float32)[:, None]    # [G, 1] branch-A selector
    w_row = (gsel * (1.0 - dw)[None, :] + (1.0 - gsel) * dw[None, :]).reshape(1, GP)
    q_row = jnp.concatenate([(2.0 * dw - 1.0).reshape(1, P),
                             jnp.zeros((1, (G - 1) * P), jnp.float32)], axis=1)

    rows = jnp.concatenate([
        preds_rows[6:6 + NUM_POINTS],      # 0..7   pred offsets (normalized)
        tgts_rows[6:6 + NUM_POINTS],       # 8..15  target offsets (pixels)
        preds_rows[0:2],                   # 16,17  cls logits
        preds_rows[2:6],                   # 18..21 pred yxtl
        tgts_rows[2:6],                    # 22..25 target yxtl
        mask.reshape(1, GP),               # 26
        regw.reshape(1, GP),               # 27
        w_row,                             # 28
        q_row,                             # 29
    ], axis=0)                                                  # (30, 96)
    slab = jnp.pad(rows, ((0, R_TOTAL - rows.shape[0]), (0, LANES - GP)))   # (32, 128)

    total = fused_loss(slab)
    matched_sec = oh[S:]                                       # one-hot matches, branch B
    return matched_sec, total


def di_lane_criterion_v4_forward(output, gt_lane, diff):
    diff_arr = jnp.stack(list(diff), axis=0)
    return _forward_impl(output['predictions_lists'], output['predictions_sec'],
                         gt_lane, diff_arr)


# ----------------------------- demo -----------------------------
if __name__ == "__main__":
    key = jax.random.PRNGKey(0)
    k = jax.random.split(key, 8)

    preds_a = jax.random.uniform(k[0], (S, P, D), jnp.float32)
    preds_b = jax.random.uniform(k[1], (S, P, D), jnp.float32)
    preds_a = preds_a.at[:, :, 0:2].set(jax.random.normal(k[2], (S, P, 2), jnp.float32))
    preds_b = preds_b.at[:, :, 0:2].set(jax.random.normal(k[3], (S, P, 2), jnp.float32))

    gt_lane = jnp.zeros((B, L, D), jnp.float32)
    gt_lane = gt_lane.at[0, :, 2:6].set(jax.random.uniform(k[4], (L, 4), jnp.float32))
    gt_lane = gt_lane.at[0, :, 6:].set(
        jax.random.uniform(k[5], (L, NUM_POINTS), jnp.float32) * (IMG_W - 1))
    gt_lane = gt_lane.at[0, 0:2, 1].set(1.0)   # two valid lanes (target[:, 1] == 1)

    diff = [jax.random.uniform(k[6], (1, P), jnp.float32),
            jax.random.uniform(k[7], (1, P), jnp.float32)]

    output = {'predictions_lists': preds_a, 'predictions_sec': preds_b}
    matched_sec, total_loss = di_lane_criterion_v4_forward(output, gt_lane, diff)
    jax.block_until_ready(total_loss)
    print("KERNEL_OK")
</pallas_src>

<mosaic_0001>
module attributes {stable_mosaic.version = 11 : i64} {
  func.func @_fused_kernel(%arg0: memref<32x128xf32, #tpu.memory_space<vmem>>, %arg1: memref<1x1xf32, #tpu.memory_space<vmem>>) attributes {dimension_semantics = [], scalar_prefetch = 0 : i64, scratch_operands = 0 : i64, tpu.core_type = #tpu.core_type<tc>} {
    %c16 = arith.constant 16 : index
    %c0 = arith.constant 0 : index
    %0 = vector.load %arg0[%c16, %c0] : memref<32x128xf32, #tpu.memory_space<vmem>>, vector<1x128xf32>
    %c17 = arith.constant 17 : index
    %c0_0 = arith.constant 0 : index
    %1 = vector.load %arg0[%c17, %c0_0] : memref<32x128xf32, #tpu.memory_space<vmem>>, vector<1x128xf32>
    %c26 = arith.constant 26 : index
    %c0_1 = arith.constant 0 : index
    %2 = vector.load %arg0[%c26, %c0_1] : memref<32x128xf32, #tpu.memory_space<vmem>>, vector<1x128xf32>
    %cst = arith.constant 5.000000e-01 : f32
    %3 = vector.broadcast %cst : f32 to vector<1x128xf32>
    %4 = arith.cmpf ogt, %2, %3 : vector<1x128xf32>
    %5 = arith.maximumf %0, %1 : vector<1x128xf32>
    %6 = arith.subf %0, %5 : vector<1x128xf32>
    %7 = math.exp %6 : vector<1x128xf32>
    %8 = arith.subf %1, %5 : vector<1x128xf32>
    %9 = math.exp %8 : vector<1x128xf32>
    %10 = arith.addf %7, %9 : vector<1x128xf32>
    %11 = math.log %10 : vector<1x128xf32>
    %12 = arith.addf %5, %11 : vector<1x128xf32>
    %13 = arith.select %4, %1, %0 : vector<1x128xi1>, vector<1x128xf32>
    %14 = arith.subf %13, %12 : vector<1x128xf32>
    %15 = math.exp %14 : vector<1x128xf32>
    %cst_2 = arith.constant 0.899999976 : f32
    %cst_3 = arith.constant 1.000000e-01 : f32
    %16 = vector.broadcast %cst_2 : f32 to vector<1x128xf32>
    %17 = vector.broadcast %cst_3 : f32 to vector<1x128xf32>
    %18 = arith.select %4, %16, %17 : vector<1x128xi1>, vector<1x128xf32>
    %cst_4 = arith.constant 1.000000e+00 : f32
    %19 = vector.broadcast %cst_4 : f32 to vector<1x128xf32>
    %20 = arith.subf %19, %15 : vector<1x128xf32>
    %cst_5 = arith.constant 0.000000e+00 : f32
    %21 = vector.broadcast %cst_5 : f32 to vector<1x128xf32>
    %22 = arith.subf %21, %18 : vector<1x128xf32>
    %23 = arith.mulf %22, %20 : vector<1x128xf32>
    %24 = arith.mulf %23, %20 : vector<1x128xf32>
    %25 = arith.mulf %24, %14 : vector<1x128xf32>
    %c18 = arith.constant 18 : index
    %c0_6 = arith.constant 0 : index
    %26 = vector.load %arg0[%c18, %c0_6] : memref<32x128xf32, #tpu.memory_space<vmem>>, vector<1x128xf32>
    %c19 = arith.constant 19 : index
    %c0_7 = arith.constant 0 : index
    %27 = vector.load %arg0[%c19, %c0_7] : memref<32x128xf32, #tpu.memory_space<vmem>>, vector<1x128xf32>
    %c20 = arith.constant 20 : index
    %c0_8 = arith.constant 0 : index
    %28 = vector.load %arg0[%c20, %c0_8] : memref<32x128xf32, #tpu.memory_space<vmem>>, vector<1x128xf32>
    %c21 = arith.constant 21 : index
    %c0_9 = arith.constant 0 : index
    %29 = vector.load %arg0[%c21, %c0_9] : memref<32x128xf32, #tpu.memory_space<vmem>>, vector<1x128xf32>
    %c22 = arith.constant 22 : index
    %c0_10 = arith.constant 0 : index
    %30 = vector.load %arg0[%c22, %c0_10] : memref<32x128xf32, #tpu.memory_space<vmem>>, vector<1x128xf32>
    %c23 = arith.constant 23 : index
    %c0_11 = arith.constant 0 : index
    %31 = vector.load %arg0[%c23, %c0_11] : memref<32x128xf32, #tpu.memory_space<vmem>>, vector<1x128xf32>
    %c24 = arith.constant 24 : index
    %c0_12 = arith.constant 0 : index
    %32 = vector.load %arg0[%c24, %c0_12] : memref<32x128xf32, #tpu.memory_space<vmem>>, vector<1x128xf32>
    %c25 = arith.constant 25 : index
    %c0_13 = arith.constant 0 : index
    %33 = vector.load %arg0[%c25, %c0_13] : memref<32x128xf32, #tpu.memory_space<vmem>>, vector<1x128xf32>
    %cst_14 = arith.constant 7.000000e+00 : f32
    %34 = vector.broadcast %cst_14 : f32 to vector<1x128xf32>
    %35 = arith.mulf %26, %34 : vector<1x128xf32>
    %cst_15 = arith.constant 6.300000e+01 : f32
    %36 = vector.broadcast %cst_15 : f32 to vector<1x128xf32>
    %37 = arith.mulf %27, %36 : vector<1x128xf32>
    %cst_16 = arith.constant 1.800000e+02 : f32
    %38 = vector.broadcast %cst_16 : f32 to vector<1x128xf32>
    %39 = arith.mulf %28, %38 : vector<1x128xf32>
    %cst_17 = arith.constant 7.000000e+00 : f32
    %40 = vector.broadcast %cst_17 : f32 to vector<1x128xf32>
    %41 = arith.mulf %29, %40 : vector<1x128xf32>
    %cst_18 = arith.constant 7.000000e+00 : f32
    %42 = vector.broadcast %cst_18 : f32 to vector<1x128xf32>
    %43 = arith.mulf %26, %42 : vector<1x128xf32>
    %44 = math.roundeven %43 : vector<1x128xf32>
    %cst_19 = arith.constant 0.000000e+00 : f32
    %cst_20 = arith.constant 7.000000e+00 : f32
    %45 = vector.broadcast %cst_19 : f32 to vector<1x128xf32>
    %46 = arith.maximumf %45, %44 : vector<1x128xf32>
    %47 = vector.broadcast %cst_20 : f32 to vector<1x128xf32>
    %48 = arith.minimumf %47, %46 : vector<1x128xf32>
    %cst_21 = arith.constant 7.000000e+00 : f32
    %49 = vector.broadcast %cst_21 : f32 to vector<1x128xf32>
    %50 = arith.mulf %30, %49 : vector<1x128xf32>
    %51 = math.roundeven %50 : vector<1x128xf32>
    %52 = arith.subf %48, %51 : vector<1x128xf32>
    %cst_22 = arith.constant 7.000000e+00 : f32
    %53 = vector.broadcast %cst_22 : f32 to vector<1x128xf32>
    %54 = arith.mulf %30, %53 : vector<1x128xf32>
    %cst_23 = arith.constant 6.300000e+01 : f32
    %55 = vector.broadcast %cst_23 : f32 to vector<1x128xf32>
    %56 = arith.mulf %31, %55 : vector<1x128xf32>
    %cst_24 = arith.constant 1.800000e+02 : f32
    %57 = vector.broadcast %cst_24 : f32 to vector<1x128xf32>
    %58 = arith.mulf %32, %57 : vector<1x128xf32>
    %59 = arith.subf %33, %52 : vector<1x128xf32>
    %cst_25 = arith.constant 7.000000e+00 : f32
    %60 = vector.broadcast %cst_25 : f32 to vector<1x128xf32>
    %61 = arith.mulf %59, %60 : vector<1x128xf32>
    %62 = arith.subf %35, %54 : vector<1x128xf32>
    %63 = math.absf %62 : vector<1x128xf32>
    %cst_26 = arith.constant 1.000000e+00 : f32
    %64 = vector.broadcast %cst_26 : f32 to vector<1x128xf32>
    %65 = arith.cmpf olt, %63, %64 : vector<1x128xf32>
    %cst_27 = arith.constant 5.000000e-01 : f32
    %66 = vector.broadcast %cst_27 : f32 to vector<1x128xf32>
    %67 = arith.mulf %66, %63 : vector<1x128xf32>
    %68 = arith.mulf %67, %63 : vector<1x128xf32>
    %cst_28 = arith.constant 5.000000e-01 : f32
    %69 = vector.broadcast %cst_28 : f32 to vector<1x128xf32>
    %70 = arith.subf %63, %69 : vector<1x128xf32>
    %71 = arith.select %65, %68, %70 : vector<1x128xi1>, vector<1x128xf32>
    %72 = arith.subf %37, %56 : vector<1x128xf32>
    %73 = math.absf %72 : vector<1x128xf32>
    %cst_29 = arith.constant 1.000000e+00 : f32
    %74 = vector.broadcast %cst_29 : f32 to vector<1x128xf32>
    %75 = arith.cmpf olt, %73, %74 : vector<1x128xf32>
    %cst_30 = arith.constant 5.000000e-01 : f32
    %76 = vector.broadcast %cst_30 : f32 to vector<1x128xf32>
    %77 = arith.mulf %76, %73 : vector<1x128xf32>
    %78 = arith.mulf %77, %73 : vector<1x128xf32>
    %cst_31 = arith.constant 5.000000e-01 : f32
    %79 = vector.broadcast %cst_31 : f32 to vector<1x128xf32>
    %80 = arith.subf %73, %79 : vector<1x128xf32>
    %81 = arith.select %75, %78, %80 : vector<1x128xi1>, vector<1x128xf32>
    %82 = arith.addf %71, %81 : vector<1x128xf32>
    %83 = arith.subf %39, %58 : vector<1x128xf32>
    %84 = math.absf %83 : vector<1x128xf32>
    %cst_32 = arith.constant 1.000000e+00 : f32
    %85 = vector.broadcast %cst_32 : f32 to vector<1x128xf32>
    %86 = arith.cmpf olt, %84, %85 : vector<1x128xf32>
    %cst_33 = arith.constant 5.000000e-01 : f32
    %87 = vector.broadcast %cst_33 : f32 to vector<1x128xf32>
    %88 = arith.mulf %87, %84 : vector<1x128xf32>
    %89 = arith.mulf %88, %84 : vector<1x128xf32>
    %cst_34 = arith.constant 5.000000e-01 : f32
    %90 = vector.broadcast %cst_34 : f32 to vector<1x128xf32>
    %91 = arith.subf %84, %90 : vector<1x128xf32>
    %92 = arith.select %86, %89, %91 : vector<1x128xi1>, vector<1x128xf32>
    %93 = arith.addf %82, %92 : vector<1x128xf32>
    %94 = arith.subf %41, %61 : vector<1x128xf32>
    %95 = math.absf %94 : vector<1x128xf32>
    %cst_35 = arith.constant 1.000000e+00 : f32
    %96 = vector.broadcast %cst_35 : f32 to vector<1x128xf32>
    %97 = arith.cmpf olt, %95, %96 : vector<1x128xf32>
    %cst_36 = arith.constant 5.000000e-01 : f32
    %98 = vector.broadcast %cst_36 : f32 to vector<1x128xf32>
    %99 = arith.mulf %98, %95 : vector<1x128xf32>
    %100 = arith.mulf %99, %95 : vector<1x128xf32>
    %cst_37 = arith.constant 5.000000e-01 : f32
    %101 = vector.broadcast %cst_37 : f32 to vector<1x128xf32>
    %102 = arith.subf %95, %101 : vector<1x128xf32>
    %103 = arith.select %97, %100, %102 : vector<1x128xi1>, vector<1x128xf32>
    %104 = arith.addf %93, %103 : vector<1x128xf32>
    %cst_38 = arith.constant 2.500000e-01 : f32
    %105 = vector.broadcast %cst_38 : f32 to vector<1x128xf32>
    %106 = arith.mulf %104, %105 : vector<1x128xf32>
    %c0_39 = arith.constant 0 : index
    %c0_40 = arith.constant 0 : index
    %107 = vector.load %arg0[%c0_39, %c0_40] : memref<32x128xf32, #tpu.memory_space<vmem>>, vector<8x128xf32>
    %cst_41 = arith.constant 6.300000e+01 : f32
    %108 = vector.broadcast %cst_41 : f32 to vector<8x128xf32>
    %109 = arith.mulf %107, %108 : vector<8x128xf32>
    %c8 = arith.constant 8 : index
    %c0_42 = arith.constant 0 : index
    %110 = vector.load %arg0[%c8, %c0_42] : memref<32x128xf32, #tpu.memory_space<vmem>>, vector<8x128xf32>
    %111 = arith.minimumf %109, %110 : vector<8x128xf32>
    %112 = arith.maximumf %109, %110 : vector<8x128xf32>
    %113 = arith.subf %111, %112 : vector<8x128xf32>
    %cst_43 = arith.constant dense<0.000000e+00> : vector<128xf32>
    %114 = vector.multi_reduction <add>, %113, %cst_43 [0] : vector<8x128xf32> to vector<128xf32>
    %115 = vector.shape_cast %114 : vector<128xf32> to vector<1x128xf32>
    %cst_44 = arith.constant 2.400000e+02 : f32
    %116 = vector.broadcast %cst_44 : f32 to vector<1x128xf32>
    %117 = arith.addf %115, %116 : vector<1x128xf32>
    %cst_45 = arith.constant 2.400000e+02 : f32
    %118 = vector.broadcast %cst_45 : f32 to vector<1x128xf32>
    %119 = arith.subf %118, %115 : vector<1x128xf32>
    %cst_46 = arith.constant 9.99999971E-10 : f32
    %120 = vector.broadcast %cst_46 : f32 to vector<1x128xf32>
    %121 = arith.addf %119, %120 : vector<1x128xf32>
    %122 = tpu.reciprocal %121 : vector<1x128xf32> -> vector<1x128xf32>
    %123 = arith.mulf %117, %122 : vector<1x128xf32>
    %cst_47 = arith.constant 1.000000e+00 : f32
    %124 = vector.broadcast %cst_47 : f32 to vector<1x128xf32>
    %125 = arith.subf %124, %123 : vector<1x128xf32>
    %c27 = arith.constant 27 : index
    %c0_48 = arith.constant 0 : index
    %126 = vector.load %arg0[%c27, %c0_48] : memref<32x128xf32, #tpu.memory_space<vmem>>, vector<1x128xf32>
    %cst_49 = arith.constant 5.000000e-01 : f32
    %127 = vector.broadcast %cst_49 : f32 to vector<1x128xf32>
    %128 = arith.mulf %106, %127 : vector<1x128xf32>
    %cst_50 = arith.constant 2.000000e+00 : f32
    %129 = vector.broadcast %cst_50 : f32 to vector<1x128xf32>
    %130 = arith.mulf %125, %129 : vector<1x128xf32>
    %131 = arith.addf %128, %130 : vector<1x128xf32>
    %cst_51 = arith.constant 0.000000e+00 : f32
    %132 = vector.broadcast %cst_51 : f32 to vector<1x128xf32>
    %133 = arith.select %4, %131, %132 : vector<1x128xi1>, vector<1x128xf32>
    %cst_52 = arith.constant 2.500000e+00 : f32
    %134 = vector.broadcast %cst_52 : f32 to vector<1x128xf32>
    %135 = arith.mulf %25, %134 : vector<1x128xf32>
    %136 = arith.mulf %126, %133 : vector<1x128xf32>
    %137 = arith.addf %135, %136 : vector<1x128xf32>
    %cst_53 = arith.constant 0.333333343 : f32
    %138 = vector.broadcast %cst_53 : f32 to vector<1x128xf32>
    %139 = arith.mulf %137, %138 : vector<1x128xf32>
    %c28 = arith.constant 28 : index
    %c0_54 = arith.constant 0 : index
    %140 = vector.load %arg0[%c28, %c0_54] : memref<32x128xf32, #tpu.memory_space<vmem>>, vector<1x128xf32>
    %c29 = arith.constant 29 : index
    %c0_55 = arith.constant 0 : index
    %141 = vector.load %arg0[%c29, %c0_55] : memref<32x128xf32, #tpu.memory_space<vmem>>, vector<1x128xf32>
    %142 = arith.mulf %140, %139 : vector<1x128xf32>
    %cst_56 = arith.constant dense<0.000000e+00> : vector<1xf32>
    %143 = vector.multi_reduction <add>, %142, %cst_56 [1] : vector<1x128xf32> to vector<1xf32>
    %144 = vector.shape_cast %143 : vector<1xf32> to vector<1x1xf32>
    %cst_57 = arith.constant dense<0.000000e+00> : vector<1xf32>
    %145 = vector.multi_reduction <add>, %141, %cst_57 [1] : vector<1x128xf32> to vector<1xf32>
    %146 = vector.shape_cast %145 : vector<1xf32> to vector<1x1xf32>
    %147 = tpu.iota {dimensions = array<i32: 1>} : vector<1x128xi32>
    %c48_i32 = arith.constant 48 : i32
    %148 = vector.broadcast %c48_i32 : i32 to vector<1x128xi32>
    %149 = arith.cmpi slt, %147, %148 : vector<1x128xi32>
    %c96_i32 = arith.constant 96 : i32
    %150 = vector.broadcast %c96_i32 : i32 to vector<1x128xi32>
    %151 = arith.cmpi slt, %147, %150 : vector<1x128xi32>
    %cst_58 = arith.constant -1.000000e+00 : f32
    %cst_59 = arith.constant 0.000000e+00 : f32
    %152 = vector.broadcast %cst_58 : f32 to vector<1x128xf32>
    %153 = vector.broadcast %cst_59 : f32 to vector<1x128xf32>
    %154 = arith.select %151, %152, %153 : vector<1x128xi1>, vector<1x128xf32>
    %cst_60 = arith.constant 1.000000e+00 : f32
    %155 = vector.broadcast %cst_60 : f32 to vector<1x128xf32>
    %156 = arith.select %149, %155, %154 : vector<1x128xi1>, vector<1x128xf32>
    %157 = arith.mulf %139, %156 : vector<1x128xf32>
    %c64_i32 = arith.constant 64 : i32
    %158 = tpu.dynamic_rotate %157 by %c64_i32 dim 1 : vector<1x128xf32>, i32 -> vector<1x128xf32>
    %159 = arith.addf %157, %158 : vector<1x128xf32>
    %c32_i32 = arith.constant 32 : i32
    %160 = tpu.dynamic_rotate %159 by %c32_i32 dim 1 : vector<1x128xf32>, i32 -> vector<1x128xf32>
    %161 = arith.addf %159, %160 : vector<1x128xf32>
    %c16_i32 = arith.constant 16 : i32
    %162 = tpu.dynamic_rotate %161 by %c16_i32 dim 1 : vector<1x128xf32>, i32 -> vector<1x128xf32>
    %163 = arith.addf %161, %162 : vector<1x128xf32>
    %c1_i32 = arith.constant 1 : i32
    %164 = tpu.dynamic_rotate %163 by %c1_i32 dim 1 : vector<1x128xf32>, i32 -> vector<1x128xf32>
    %165 = arith.cmpf olt, %164, %163 : vector<1x128xf32>
    %166 = arith.extui %165 : vector<1x128xi1> to vector<1x128xi32>
    %167 = arith.sitofp %166 : vector<1x128xi32> to vector<1x128xf32>
    %168 = arith.cmpf ole, %164, %163 : vector<1x128xf32>
    %169 = arith.extui %168 : vector<1x128xi1> to vector<1x128xi32>
    %170 = arith.sitofp %169 : vector<1x128xi32> to vector<1x128xf32>
    %c2_i32 = arith.constant 2 : i32
    %171 = tpu.dynamic_rotate %163 by %c2_i32 dim 1 : vector<1x128xf32>, i32 -> vector<1x128xf32>
    %172 = arith.cmpf olt, %171, %163 : vector<1x128xf32>
    %173 = arith.extui %172 : vector<1x128xi1> to vector<1x128xi32>
    %174 = arith.sitofp %173 : vector<1x128xi32> to vector<1x128xf32>
    %175 = arith.cmpf ole, %171, %163 : vector<1x128xf32>
    %176 = arith.extui %175 : vector<1x128xi1> to vector<1x128xi32>
    %177 = arith.sitofp %176 : vector<1x128xi32> to vector<1x128xf32>
    %c3_i32 = arith.constant 3 : i32
    %178 = tpu.dynamic_rotate %163 by %c3_i32 dim 1 : vector<1x128xf32>, i32 -> vector<1x128xf32>
    %179 = arith.cmpf olt, %178, %163 : vector<1x128xf32>
    %180 = arith.extui %179 : vector<1x128xi1> to vector<1x128xi32>
    %181 = arith.sitofp %180 : vector<1x128xi32> to vector<1x128xf32>
    %182 = arith.cmpf ole, %178, %163 : vector<1x128xf32>
    %183 = arith.extui %182 : vector<1x128xi1> to vector<1x128xi32>
    %184 = arith.sitofp %183 : vector<1x128xi32> to vector<1x128xf32>
    %c4_i32 = arith.constant 4 : i32
    %185 = tpu.dynamic_rotate %163 by %c4_i32 dim 1 : vector<1x128xf32>, i32 -> vector<1x128xf32>
    %186 = arith.cmpf olt, %185, %163 : vector<1x128xf32>
    %187 = arith.extui %186 : vector<1x128xi1> to vector<1x128xi32>
    %188 = arith.sitofp %187 : vector<1x128xi32> to vector<1x128xf32>
    %189 = arith.cmpf ole, %185, %163 : vector<1x128xf32>
    %190 = arith.extui %189 : vector<1x128xi1> to vector<1x128xi32>
    %191 = arith.sitofp %190 : vector<1x128xi32> to vector<1x128xf32>
    %c5_i32 = arith.constant 5 : i32
    %192 = tpu.dynamic_rotate %163 by %c5_i32 dim 1 : vector<1x128xf32>, i32 -> vector<1x128xf32>
    %193 = arith.cmpf olt, %192, %163 : vector<1x128xf32>
    %194 = arith.extui %193 : vector<1x128xi1> to vector<1x128xi32>
    %195 = arith.sitofp %194 : vector<1x128xi32> to vector<1x128xf32>
    %196 = arith.cmpf ole, %192, %163 : vector<1x128xf32>
    %197 = arith.extui %196 : vector<1x128xi1> to vector<1x128xi32>
    %198 = arith.sitofp %197 : vector<1x128xi32> to vector<1x128xf32>
    %c6_i32 = arith.constant 6 : i32
    %199 = tpu.dynamic_rotate %163 by %c6_i32 dim 1 : vector<1x128xf32>, i32 -> vector<1x128xf32>
    %200 = arith.cmpf olt, %199, %163 : vector<1x128xf32>
    %201 = arith.extui %200 : vector<1x128xi1> to vector<1x128xi32>
    %202 = arith.sitofp %201 : vector<1x128xi32> to vector<1x128xf32>
    %203 = arith.cmpf ole, %199, %163 : vector<1x128xf32>
    %204 = arith.extui %203 : vector<1x128xi1> to vector<1x128xi32>
    %205 = arith.sitofp %204 : vector<1x128xi32> to vector<1x128xf32>
    %c7_i32 = arith.constant 7 : i32
    %206 = tpu.dynamic_rotate %163 by %c7_i32 dim 1 : vector<1x128xf32>, i32 -> vector<1x128xf32>
    %207 = arith.cmpf olt, %206, %163 : vector<1x128xf32>
    %208 = arith.extui %207 : vector<1x128xi1> to vector<1x128xi32>
    %209 = arith.sitofp %208 : vector<1x128xi32> to vector<1x128xf32>
    %210 = arith.cmpf ole, %206, %163 : vector<1x128xf32>
    %211 = arith.extui %210 : vector<1x128xi1> to vector<1x128xi32>
    %212 = arith.sitofp %211 : vector<1x128xi32> to vector<1x128xf32>
    %c8_i32 = arith.constant 8 : i32
    %213 = tpu.dynamic_rotate %163 by %c8_i32 dim 1 : vector<1x128xf32>, i32 -> vector<1x128xf32>
    %214 = arith.cmpf olt, %213, %163 : vector<1x128xf32>
    %215 = arith.extui %214 : vector<1x128xi1> to vector<1x128xi32>
    %216 = arith.sitofp %215 : vector<1x128xi32> to vector<1x128xf32>
    %217 = arith.cmpf ole, %213, %163 : vector<1x128xf32>
    %218 = arith.extui %217 : vector<1x128xi1> to vector<1x128xi32>
    %219 = arith.sitofp %218 : vector<1x128xi32> to vector<1x128xf32>
    %c9_i32 = arith.constant 9 : i32
    %220 = tpu.dynamic_rotate %163 by %c9_i32 dim 1 : vector<1x128xf32>, i32 -> vector<1x128xf32>
    %221 = arith.cmpf olt, %220, %163 : vector<1x128xf32>
    %222 = arith.extui %221 : vector<1x128xi1> to vector<1x128xi32>
    %223 = arith.sitofp %222 : vector<1x128xi32> to vector<1x128xf32>
    %224 = arith.cmpf ole, %220, %163 : vector<1x128xf32>
    %225 = arith.extui %224 : vector<1x128xi1> to vector<1x128xi32>
    %226 = arith.sitofp %225 : vector<1x128xi32> to vector<1x128xf32>
    %c10_i32 = arith.constant 10 : i32
    %227 = tpu.dynamic_rotate %163 by %c10_i32 dim 1 : vector<1x128xf32>, i32 -> vector<1x128xf32>
    %228 = arith.cmpf olt, %227, %163 : vector<1x128xf32>
    %229 = arith.extui %228 : vector<1x128xi1> to vector<1x128xi32>
    %230 = arith.sitofp %229 : vector<1x128xi32> to vector<1x128xf32>
    %231 = arith.cmpf ole, %227, %163 : vector<1x128xf32>
    %232 = arith.extui %231 : vector<1x128xi1> to vector<1x128xi32>
    %233 = arith.sitofp %232 : vector<1x128xi32> to vector<1x128xf32>
    %c11_i32 = arith.constant 11 : i32
    %234 = tpu.dynamic_rotate %163 by %c11_i32 dim 1 : vector<1x128xf32>, i32 -> vector<1x128xf32>
    %235 = arith.cmpf olt, %234, %163 : vector<1x128xf32>
    %236 = arith.extui %235 : vector<1x128xi1> to vector<1x128xi32>
    %237 = arith.sitofp %236 : vector<1x128xi32> to vector<1x128xf32>
    %238 = arith.cmpf ole, %234, %163 : vector<1x128xf32>
    %239 = arith.extui %238 : vector<1x128xi1> to vector<1x128xi32>
    %240 = arith.sitofp %239 : vector<1x128xi32> to vector<1x128xf32>
    %c12_i32 = arith.constant 12 : i32
    %241 = tpu.dynamic_rotate %163 by %c12_i32 dim 1 : vector<1x128xf32>, i32 -> vector<1x128xf32>
    %242 = arith.cmpf olt, %241, %163 : vector<1x128xf32>
    %243 = arith.extui %242 : vector<1x128xi1> to vector<1x128xi32>
    %244 = arith.sitofp %243 : vector<1x128xi32> to vector<1x128xf32>
    %245 = arith.cmpf ole, %241, %163 : vector<1x128xf32>
    %246 = arith.extui %245 : vector<1x128xi1> to vector<1x128xi32>
    %247 = arith.sitofp %246 : vector<1x128xi32> to vector<1x128xf32>
    %c13_i32 = arith.constant 13 : i32
    %248 = tpu.dynamic_rotate %163 by %c13_i32 dim 1 : vector<1x128xf32>, i32 -> vector<1x128xf32>
    %249 = arith.cmpf olt, %248, %163 : vector<1x128xf32>
    %250 = arith.extui %249 : vector<1x128xi1> to vector<1x128xi32>
    %251 = arith.sitofp %250 : vector<1x128xi32> to vector<1x128xf32>
    %252 = arith.cmpf ole, %248, %163 : vector<1x128xf32>
    %253 = arith.extui %252 : vector<1x128xi1> to vector<1x128xi32>
    %254 = arith.sitofp %253 : vector<1x128xi32> to vector<1x128xf32>
    %c14_i32 = arith.constant 14 : i32
    %255 = tpu.dynamic_rotate %163 by %c14_i32 dim 1 : vector<1x128xf32>, i32 -> vector<1x128xf32>
    %256 = arith.cmpf olt, %255, %163 : vector<1x128xf32>
    %257 = arith.extui %256 : vector<1x128xi1> to vector<1x128xi32>
    %258 = arith.sitofp %257 : vector<1x128xi32> to vector<1x128xf32>
    %259 = arith.cmpf ole, %255, %163 : vector<1x128xf32>
    %260 = arith.extui %259 : vector<1x128xi1> to vector<1x128xi32>
    %261 = arith.sitofp %260 : vector<1x128xi32> to vector<1x128xf32>
    %c15_i32 = arith.constant 15 : i32
    %262 = tpu.dynamic_rotate %163 by %c15_i32 dim 1 : vector<1x128xf32>, i32 -> vector<1x128xf32>
    %263 = arith.cmpf olt, %262, %163 : vector<1x128xf32>
    %264 = arith.extui %263 : vector<1x128xi1> to vector<1x128xi32>
    %265 = arith.sitofp %264 : vector<1x128xi32> to vector<1x128xf32>
    %266 = arith.cmpf ole, %262, %163 : vector<1x128xf32>
    %267 = arith.extui %266 : vector<1x128xi1> to vector<1x128xi32>
    %268 = arith.sitofp %267 : vector<1x128xi32> to vector<1x128xf32>
    %269 = arith.addf %167, %174 : vector<1x128xf32>
    %270 = arith.addf %181, %188 : vector<1x128xf32>
    %271 = arith.addf %195, %202 : vector<1x128xf32>
    %272 = arith.addf %209, %216 : vector<1x128xf32>
    %273 = arith.addf %223, %230 : vector<1x128xf32>
    %274 = arith.addf %237, %244 : vector<1x128xf32>
    %275 = arith.addf %251, %258 : vector<1x128xf32>
    %276 = arith.addf %269, %270 : vector<1x128xf32>
    %277 = arith.addf %271, %272 : vector<1x128xf32>
    %278 = arith.addf %273, %274 : vector<1x128xf32>
    %279 = arith.addf %275, %265 : vector<1x128xf32>
    %280 = arith.addf %276, %277 : vector<1x128xf32>
    %281 = arith.addf %278, %279 : vector<1x128xf32>
    %282 = arith.addf %280, %281 : vector<1x128xf32>
    %283 = arith.addf %170, %177 : vector<1x128xf32>
    %284 = arith.addf %184, %191 : vector<1x128xf32>
    %285 = arith.addf %198, %205 : vector<1x128xf32>
    %286 = arith.addf %212, %219 : vector<1x128xf32>
    %287 = arith.addf %226, %233 : vector<1x128xf32>
    %288 = arith.addf %240, %247 : vector<1x128xf32>
    %289 = arith.addf %254, %261 : vector<1x128xf32>
    %290 = arith.addf %283, %284 : vector<1x128xf32>
    %291 = arith.addf %285, %286 : vector<1x128xf32>
    %292 = arith.addf %287, %288 : vector<1x128xf32>
    %293 = arith.addf %289, %268 : vector<1x128xf32>
    %294 = arith.addf %290, %291 : vector<1x128xf32>
    %295 = arith.addf %292, %293 : vector<1x128xf32>
    %296 = arith.addf %294, %295 : vector<1x128xf32>
    %cst_61 = arith.constant 7.000000e+00 : f32
    %297 = vector.broadcast %cst_61 : f32 to vector<1x128xf32>
    %298 = arith.cmpf ole, %282, %297 : vector<1x128xf32>
    %cst_62 = arith.constant 7.000000e+00 : f32
    %299 = vector.broadcast %cst_62 : f32 to vector<1x128xf32>
    %300 = arith.cmpf oge, %296, %299 : vector<1x128xf32>
    %301 = arith.andi %298, %300 : vector<1x128xi1>
    %cst_63 = arith.constant -3.000000e+38 : f32
    %302 = vector.broadcast %cst_63 : f32 to vector<1x128xf32>
    %303 = arith.select %301, %163, %302 : vector<1x128xi1>, vector<1x128xf32>
    %cst_64 = arith.constant dense<0xFF800000> : vector<1xf32>
    %304 = vector.multi_reduction <maximumf>, %303, %cst_64 [1] : vector<1x128xf32> to vector<1xf32>
    %305 = vector.shape_cast %304 : vector<1xf32> to vector<1x1xf32>
    %cst_65 = arith.constant 5.000000e-01 : f32
    %306 = vector.broadcast %cst_65 : f32 to vector<1x1xf32>
    %307 = arith.mulf %306, %305 : vector<1x1xf32>
    %308 = arith.mulf %307, %146 : vector<1x1xf32>
    %309 = arith.addf %144, %308 : vector<1x1xf32>
    %c0_66 = arith.constant 0 : index
    %c0_67 = arith.constant 0 : index
    %310 = vector.load %arg1[%c0_66, %c0_67] : memref<1x1xf32, #tpu.memory_space<vmem>>, vector<1x1xf32>
    tpu.vector_store %arg1[%c0_66, %c0_67], %309 {strides = array<i32>} : memref<1x1xf32, #tpu.memory_space<vmem>>, vector<1x1xf32>,
    return
  }
}

</mosaic_0001>

<bundles_post_ra>
// kernel: custom-call
= control target key start
LH: loop header
LB: loop body
LE: loop exit
PB: predicated region body
PF: predicated region fallthrough
CT: control target
= control target key end

     0   :  { %s6_s0 = inlined_call_operand.vmem [shape: pred[6,16], index: 0, kind: output, shape index: {}]  }

// kernel: mul.19
= control target key start
LH: loop header
LB: loop body
LE: loop exit
PB: predicated region body
PF: predicated region fallthrough
CT: control target
= control target key end

     0   :  { %s34_s0 = inlined_call_operand.vmem [shape: f32[1,96], index: 0, kind: input, shape index: {}]   ;;  %s35_s1 = inlined_call_operand.vmem [shape: f32[1,96], index: 1, kind: input, shape index: {}]   ;;  %s36_s2 = inlined_call_operand.vmem [shape: f32[1,96], index: 2, kind: output, shape index: {}]  }
   0x1   :  { %v3_v0 = vld [vmem:[%s34_s0] sm:$0x1] }
   0x2   :  { %v4_v1 = vld [vmem:[%s35_s1] sm:$0x1] }
   0x3   :  { %v7_v2 = vmul.f32 %v4_v1, %v3_v0 }
   0x5   :  { %9 = vst [vmem:[%s36_s2] sm:$0x1] %v7_v2 }

// kernel: _forward_impl.1
= control target key start
LH: loop header
LB: loop body
LE: loop exit
PB: predicated region body
PF: predicated region fallthrough
CT: control target
= control target key end

     0   :  { %s601_s0 = inlined_call_operand.vmem [shape: f32[32,128], index: 0, kind: input, shape index: {}]   ;;  %s602_s1 = inlined_call_operand.hbm [shape: f32[1,1], index: 1, kind: output, shape index: {}]  }
   0x1   :  { %v440_v0 = vld [vmem:[%s601_s0 + $0x10] sm:$0x1]  ;;  %v445_v1 = vld [vmem:[%s601_s0 + $0x11] sm:$0x1]  ;;  %v34_v3 = vld [vmem:[%s601_s0 + $0x12] sm:$0x1] }
   0x2   :  { %v449_v2 = vmax.f32 %v440_v0, %v445_v1  ;;  %v38_v6 = vld [vmem:[%s601_s0 + $0x16] sm:$0x1]  ;;  %v42_v7 = vmul.f32 7.0, %v34_v3  ;;  %v35_v8 = vld [vmem:[%s601_s0 + $0x13] sm:$0x1]  ;;  %v88_v10 = vld [vmem:[%s601_s0] sm:$0xff] }
   0x3   :  { %v39_v9 = vld [vmem:[%s601_s0 + $0x17] sm:$0x1]  ;;  %v36_v13 = vld [vmem:[%s601_s0 + $0x14] sm:$0x1]  ;;  %v40_v14 = vld [vmem:[%s601_s0 + $0x18] sm:$0x1] }
   0x4   :  { %v14_v4 = vsub.f32 %v440_v0, %v449_v2  ;;  %v17_v5 = vsub.f32 %v445_v1, %v449_v2  ;;  %v349_v15 = vround.rtne.f32 %v42_v7  ;;  %v49_v16 = vmul.f32 7.0, %v38_v6  ;;  %v90_v17 = vld [vmem:[%s601_s0 + $0x8] sm:$0xff] }
   0x5   :  { %v43_v18 = vmul.f32 63.0, %v35_v8  ;;  %v52_v19 = vmul.f32 63.0, %v39_v9  ;;  %v89_v20 = vmul.f32 63.0, %v88_v10 }
   0x6   :  { %v15_v11 = vmul.f32 1.442695, %v14_v4  ;;  %v18_v12 = vmul.f32 1.442695, %v17_v5 }
   0x8   :  { %372 = vpow2.f32 %v15_v11 }
   0x9   :  { %6 = vsyncpa [#allocation3], 0  ;;  %374 = vpow2.f32 %v18_v12  ;;  %v47_v21 = vmax.f32 %v349_v15, 0.0  ;;  %v350_v22 = vround.rtne.f32 %v49_v16  ;;  %v91_v23 = vmin.f32 %v89_v20, %v90_v17  ;;  %v41_v29 = vld [vmem:[%s601_s0 + $0x19] sm:$0x1]  ;;  %s408_s5 = smov 64  }
   0xa   :  { %v92_v24 = vmax.f32 %v89_v20, %v90_v17  ;;  %v44_v25 = vmul.f32 180.0, %v36_v13  ;;  %v53_v27 = vmul.f32 180.0, %v40_v14  ;;  %v56_v28 = vsub.f32 %v42_v7, %v49_v16  ;;  %v37_v32 = vld [vmem:[%s601_s0 + $0x15] sm:$0x1]  ;;  %v11_v61 = vld [vmem:[%s601_s0 + $0x1a] sm:$0x1] }
   0xb   :  { %v48_v26 = vmin.f32 %v47_v21, 7.0  ;;  %v63_v30 = vsub.f32 %v43_v18, %v52_v19  ;;  %v45_v37 = vmul.f32 7.0, %v37_v32  ;;  %vm12_vm3 = vcmp.gt.f32.partialorder %v11_v61, 0.5  ;;  %v106_v32 = vld [vmem:[%s601_s0 + $0x1b] sm:$0x1]  ;;  %s409_s6 = smov 32  }
   0xc   :  { %v93_v31 = vsub.f32 %v91_v23, %v92_v24  ;;  %v57_v35 = vand.u32 2147483647, %v56_v28  ;;  %v71_v36 = vsub.f32 %v44_v25, %v53_v27  ;;  %v24_v12 = vsel %vm12_vm3, %v445_v1, %v440_v0  ;;  %s410_s7 = smov 16   ;;  %s411_s8 = smov 2  }
   0xd   :  { %v51_v33 = vsub.f32 %v48_v26, %v350_v22  ;;  %v64_v38 = vand.u32 2147483647, %v63_v30  ;;  %v406_v24 = vmov 0.1   ;;  %v125_v28 = vlaneseq  ;;  %s412_s9 = smov 1   ;;  %s413_s10 = smov 4  }
   0xe   :  { %v94_v39 = vrot.slane %v93_v31, 4  ;;  %v59_v44 = vmul.f32 0.5, %v57_v35  ;;  %v72_v45 = vand.u32 2147483647, %v71_v36  ;;  %vm58_vm0 = vcmp.lt.f32.partialorder %v57_v35, 1.0  ;;  %s414_s11 = smov 3  }
   0xf   :  { %v54_v34 = vsub.f32 %v41_v29, %v51_v33  ;;  %v66_v47 = vmul.f32 0.5, %v64_v38  ;;  %v315_v52 = vadd.f32 -0.5, %v57_v35  ;;  %v316_v53 = vadd.f32 -0.5, %v64_v38  ;;  %s415_s12 = smov 6   ;;  %s416_s13 = smov 5  }
  0x10   :  { %v95_v42 = vadd.f32 %v94_v39, %v93_v31  ;;  %v60_v51 = vmul.f32 %v59_v44, %v57_v35  ;;  %v74_v55 = vmul.f32 0.5, %v72_v45  ;;  %vm65_vm1 = vcmp.lt.f32.partialorder %v64_v38, 1.0  ;;  %s417_s14 = smov 8   ;;  %s418_s15 = smov 7  }
  0x11   :  { %v55_v40 = vmul.f32 7.0, %v54_v34  ;;  %v67_v54 = vmul.f32 %v66_v47, %v64_v38  ;;  %v317_v60 = vadd.f32 -0.5, %v72_v45  ;;  %vm73_vm2 = vcmp.lt.f32.partialorder %v72_v45, 1.0  ;;  %s419_s16 = smov 10   ;;  %s420_s17 = smov 9  }
  0x12   :  { %v373_v41 = vpop.eup %372  ;;  %v96_v49 = vrot.slane %v95_v42, 2  ;;  %v62_v59 = vsel %vm58_vm0, %v60_v51, %v315_v52  ;;  %v75_v63 = vmul.f32 %v74_v55, %v72_v45  ;;  %v28_v25 = vsel %vm12_vm3, 0.9, %v406_v24  ;;  %s421_s18 = smov 12   ;;  %s422_s19 = smov 11  }
  0x13   :  { %v375_v43 = vpop.eup %374  ;;  %v79_v48 = vsub.f32 %v45_v37, %v55_v40  ;;  %v69_v62 = vsel %vm65_vm1, %v67_v54, %v316_v53  ;;  %v30_v0 = vsub.f32 0.0, %v28_v25  ;;  %v126_v30 = vand.u32 127, %v125_v28  ;;  %s423_s20 = smov 14   ;;  %s424_s21 = smov 13  }
  0x14   :  { %v20_v46 = vadd.f32 %v375_v43, %v373_v41  ;;  %v97_v50 = vadd.f32 %v96_v49, %v95_v42  ;;  %v70_v6 = vadd.f32 %v69_v62, %v62_v59  ;;  %v77_v8 = vsel %vm73_vm2, %v75_v63, %v317_v60  ;;  %s425_s22 = smov 15   ;;  %s426_s27 = smov [#allocation2]  }
  0x15   :  { %v80_v56 = vand.u32 2147483647, %v79_v48  ;;  %vm128_vm5 = vcmp.lt.s32.totalorder %v126_v30, 96  ;;  %vm127_vm6 = vcmp.lt.s32.totalorder %v126_v30, 48  ;;  %v407_v38 = vmov 0.0   ;;  %s307_s28 = sshll.u32 %s426_s27, 4  ;;  %s308_s28 = int_to_ptr.vmem [resolvable:$true] %s307_s28 }
  0x16   :  { %376 = vlog2.f32 %v20_v46  ;;  %v98_v57 = vrot.slane %v97_v50, 1  ;;  %v78_v14 = vadd.f32 %v77_v8, %v70_v6  ;;  %v129_v39 = vsel %vm128_vm5, -1.0, %v407_v38  ;;  %s386_s29 = scalar_lea.vmem %s308_s28, 32  ;;  %p387_p1 = scmp.lt.s32.totalorder %s308_s28, %s308_s28 }
  0x17   :  { %v82_v3 = vmul.f32 0.5, %v80_v56  ;;  %v318_v10 = vadd.f32 -0.5, %v80_v56  ;;  %vm81_vm4 = vcmp.lt.f32.partialorder %v80_v56, 1.0  ;;  %v130_v41 = vsel %vm127_vm6, 1.0, %v129_v39 }
  0x18   :  { %v99_v58 = vadd.f32 %v98_v57, %v97_v50  ;;  %v116_v50 = vld [vmem:[%s601_s0 + $0x1d] sm:$0x1]  ;;  %vm118_vm7 = vcmask 1040384  }
  0x19   :  { %v83_v9 = vmul.f32 %v82_v3, %v80_v56  ;;  %v122_v51 = vsel %vm118_vm7, %v116_v50, 0.0 }
  0x1a   :  { %v101_v4 = vsub.f32 240.0, %v99_v58  ;;  %v100_v19 = vadd.f32 240.0, %v99_v58 }
  0x1b   :  { %v85_v15 = vsel %vm81_vm4, %v83_v9, %v318_v10 }
  0x1c   :  { %v102_v5 = vadd.f32 1e-09, %v101_v4  ;;  %v86_v18 = vadd.f32 %v85_v15, %v78_v14 }
  0x1e   :  { %378 = vrcp.f32 %v102_v5  ;;  %v87_v21 = vmul.f32 0.25, %v86_v18 }
  0x20   :  { %v377_v7 = vpop.eup %376  ;;  %v107_v26 = vmul.f32 0.5, %v87_v21 }
  0x21   :  { %v22_v11 = vmul.f32 0.6931472, %v377_v7 }
  0x23   :  { %v23_v13 = vadd.f32 %v22_v11, %v449_v2 }
  0x25   :  { %v25_v16 = vsub.f32 %v24_v12, %v23_v13 }
  0x27   :  { %v26_v17 = vmul.f32 1.442695, %v25_v16 }
  0x28   :  { %v379_v20 = vpop.eup %378 }
  0x29   :  { %380 = vpow2.f32 %v26_v17  ;;  %v104_v22 = vmul.f32 %v379_v20, %v100_v19 }
  0x2b   :  { %v105_v23 = vsub.f32 1.0, %v104_v22 }
  0x2d   :  { %v108_v27 = vmul.f32 2.0, %v105_v23 }
  0x2f   :  { %v109_v2 = vadd.f32 %v108_v27, %v107_v26 }
  0x31   :  { %v110_v33 = vsel %vm12_vm3, %v109_v2, 0.0 }
  0x32   :  { %v112_v36 = vmul.f32 %v110_v33, %v106_v32 }
  0x33   :  { %v381_v1 = vpop.eup %380 }
  0x34   :  { %v29_v29 = vsub.f32 1.0, %v381_v1 }
  0x36   :  { %v31_v31 = vmul.f32 %v30_v0, %v29_v29 }
  0x38   :  { %v32_v34 = vmul.f32 %v31_v31, %v29_v29 }
  0x3a   :  { %v33_v35 = vmul.f32 %v32_v34, %v25_v16 }
  0x3c   :  { %v111_v37 = vmul.f32 2.5, %v33_v35 }
  0x3e   :  { %v113_v40 = vadd.f32 %v112_v36, %v111_v37 }
  0x40   :  { %v498_v42 = vmul.f32 0.33333334, %v113_v40 }
  0x42   :  { %v131_v43 = vmul.f32 %v130_v41, %v498_v42 }
  0x44   :  { %132 = vrot.lane.b32.xlu0 %v131_v43, %s408_s5 }
  0xb6   :  { %v133_v44 = vpop.permute.xlu0 %132 }
  0xb7   :  { %v134_v45 = vadd.f32 %v133_v44, %v131_v43 }
  0xb9   :  { %135 = vrot.lane.b32.xlu0 %v134_v45, %s409_s6 }
 0x12b   :  { %v136_v46 = vpop.permute.xlu0 %135 }
 0x12c   :  { %v137_v47 = vadd.f32 %v136_v46, %v134_v45 }
 0x12e   :  { %138 = vrot.lane.b32.xlu1 %v137_v47, %s410_s7 }
 0x1a0   :  { %v139_v48 = vpop.permute.xlu1 %138 }
 0x1a1   :  { %v501_v49 = vadd.f32 %v139_v48, %v137_v47 }
 0x1a3   :  { %149 = vrot.lane.b32.xlu0 %v501_v49, %s411_s8  ;;  %141 = vrot.lane.b32.xlu1 %v501_v49, %s412_s9 }
 0x1a7   :  { %165 = vrot.lane.b32.xlu0 %v501_v49, %s413_s10  ;;  %157 = vrot.lane.b32.xlu1 %v501_v49, %s414_s11 }
 0x1ab   :  { %181 = vrot.lane.b32.xlu0 %v501_v49, %s415_s12  ;;  %173 = vrot.lane.b32.xlu1 %v501_v49, %s416_s13 }
 0x1af   :  { %197 = vrot.lane.b32.xlu0 %v501_v49, %s417_s14  ;;  %189 = vrot.lane.b32.xlu1 %v501_v49, %s418_s15 }
 0x1b3   :  { %213 = vrot.lane.b32.xlu0 %v501_v49, %s419_s16  ;;  %205 = vrot.lane.b32.xlu1 %v501_v49, %s420_s17 }
 0x1b7   :  { %229 = vrot.lane.b32.xlu0 %v501_v49, %s421_s18  ;;  %221 = vrot.lane.b32.xlu1 %v501_v49, %s422_s19 }
 0x1bb   :  { %245 = vrot.lane.b32.xlu0 %v501_v49, %s423_s20  ;;  %237 = vrot.lane.b32.xlu1 %v501_v49, %s424_s21 }
 0x1bf   :  { %253 = vrot.lane.b32.xlu1 %v501_v49, %s425_s22 }
 0x1e3   :  { %123 = vadd.xlane.f32.xlu1 %v122_v51 }
 0x215   :  { %v150_v52 = vpop.permute.xlu0 %149  ;;  %v142_v53 = vpop.permute.xlu1 %141 }
 0x216   :  { %vm151_vm8 = vcmp.lt.f32.partialorder %v150_v52, %v501_v49  ;;  %vm154_vm9 = vcmp.le.f32.partialorder %v150_v52, %v501_v49  ;;  %vm143_vm10 = vcmp.lt.f32.partialorder %v142_v53, %v501_v49  ;;  %vm146_vm11 = vcmp.le.f32.partialorder %v142_v53, %v501_v49 }
 0x217   :  { %v321_v60 = vsel %vm151_vm8, 1.0, %v407_v38  ;;  %v322_v61 = vsel %vm154_vm9, 1.0, %v407_v38  ;;  %v319_v62 = vsel %vm143_vm10, 1.0, %v407_v38  ;;  %v320_v63 = vsel %vm146_vm11, 1.0, %v407_v38 }
 0x218   :  { %v261_v9 = vadd.f32 %v321_v60, %v319_v62  ;;  %v275_v10 = vadd.f32 %v322_v61, %v320_v63 }
 0x219   :  { %v166_v54 = vpop.permute.xlu0 %165  ;;  %v158_v55 = vpop.permute.xlu1 %157 }
 0x21a   :  { %vm167_vm12 = vcmp.lt.f32.partialorder %v166_v54, %v501_v49  ;;  %vm170_vm13 = vcmp.le.f32.partialorder %v166_v54, %v501_v49  ;;  %vm159_vm14 = vcmp.lt.f32.partialorder %v158_v55, %v501_v49  ;;  %vm162_vm15 = vcmp.le.f32.partialorder %v158_v55, %v501_v49 }
 0x21b   :  { %v325_v3 = vsel %vm167_vm12, 1.0, %v407_v38  ;;  %v326_v4 = vsel %vm170_vm13, 1.0, %v407_v38  ;;  %v323_v5 = vsel %vm159_vm14, 1.0, %v407_v38  ;;  %v324_v6 = vsel %vm162_vm15, 1.0, %v407_v38 }
 0x21c   :  { %v262_v11 = vadd.f32 %v325_v3, %v323_v5  ;;  %v276_v12 = vadd.f32 %v326_v4, %v324_v6  ;;  %v115_v3 = vld [vmem:[%s601_s0 + $0x1c] sm:$0x1]  ;;  %s382_s0 = scalar_lea.vmem %s308_s28, 16 }
 0x21d   :  { %v182_v56 = vpop.permute.xlu0 %181  ;;  %v174_v57 = vpop.permute.xlu1 %173  ;;  %v117_v4 = vmul.f32 %v115_v3, %v498_v42  ;;  %p383_p0 = scmp.ne.s32.totalorder %s308_s28, %s382_s0  ;;  %p388_p2 = scmp.lt.s32.totalorder %s386_s29, %s382_s0 }
 0x21e   :  { %vm183_vm0 = vcmp.lt.f32.partialorder %v182_v56, %v501_v49  ;;  %vm186_vm1 = vcmp.le.f32.partialorder %v182_v56, %v501_v49  ;;  %vm175_vm2 = vcmp.lt.f32.partialorder %v174_v57, %v501_v49  ;;  %vm178_vm3 = vcmp.le.f32.partialorder %v174_v57, %v501_v49 }
 0x21f   :  { %v329_v13 = vsel %vm183_vm0, 1.0, %v407_v38  ;;  %v330_v14 = vsel %vm186_vm1, 1.0, %v407_v38  ;;  %v327_v15 = vsel %vm175_vm2, 1.0, %v407_v38  ;;  %v328_v16 = vsel %vm178_vm3, 1.0, %v407_v38  ;;  %p389_p3 = por %p388_p2, %p387_p1 }
 0x220   :  { %v263_v23 = vadd.f32 %v329_v13, %v327_v15  ;;  %v277_v24 = vadd.f32 %v330_v14, %v328_v16  ;;  %v268_v50 = vadd.f32 %v262_v11, %v261_v9  ;;  %v282_v51 = vadd.f32 %v276_v12, %v275_v10 }
 0x221   :  { %v198_v58 = vpop.permute.xlu0 %197  ;;  %v190_v59 = vpop.permute.xlu1 %189  ;;  %v119_v6 = vsel %vm118_vm7, %v117_v4, 0.0  ;;  %p390_p4 = pnand %p389_p3, %p383_p0 }
 0x222   :  { %vm199_vm4 = vcmp.lt.f32.partialorder %v198_v58, %v501_v49  ;;  %vm202_vm5 = vcmp.le.f32.partialorder %v198_v58, %v501_v49  ;;  %vm191_vm6 = vcmp.lt.f32.partialorder %v190_v59, %v501_v49  ;;  %vm194_vm8 = vcmp.le.f32.partialorder %v190_v59, %v501_v49 }
 0x223   :  { %v333_v17 = vsel %vm199_vm4, 1.0, %v407_v38  ;;  %v334_v18 = vsel %vm202_vm5, 1.0, %v407_v38  ;;  %v331_v19 = vsel %vm191_vm6, 1.0, %v407_v38  ;;  %v332_v20 = vsel %vm194_vm8, 1.0, %v407_v38 }
 0x224   :  { %v264_v25 = vadd.f32 %v333_v17, %v331_v19  ;;  %v278_v26 = vadd.f32 %v334_v18, %v332_v20 }
 0x225   :  { %v214_v7 = vpop.permute.xlu0 %213  ;;  %v206_v8 = vpop.permute.xlu1 %205 }
 0x226   :  { %vm215_vm9 = vcmp.lt.f32.partialorder %v214_v7, %v501_v49  ;;  %vm218_vm10 = vcmp.le.f32.partialorder %v214_v7, %v501_v49  ;;  %vm207_vm15 = vcmp.lt.f32.partialorder %v206_v8, %v501_v49  ;;  %vm210_vm0 = vcmp.le.f32.partialorder %v206_v8, %v501_v49 }
 0x227   :  { %v337_v27 = vsel %vm215_vm9, 1.0, %v407_v38  ;;  %v338_v28 = vsel %vm218_vm10, 1.0, %v407_v38  ;;  %v335_v32 = vsel %vm207_vm15, 1.0, %v407_v38  ;;  %v336_v33 = vsel %vm210_vm0, 1.0, %v407_v38 }
 0x228   :  { %v269_v41 = vadd.f32 %v264_v25, %v263_v23  ;;  %v283_v43 = vadd.f32 %v278_v26, %v277_v24  ;;  %v265_v44 = vadd.f32 %v337_v27, %v335_v32  ;;  %v279_v45 = vadd.f32 %v338_v28, %v336_v33 }
 0x229   :  { %v230_v21 = vpop.permute.xlu0 %229  ;;  %v222_v22 = vpop.permute.xlu1 %221 }
 0x22a   :  { %vm231_vm11 = vcmp.lt.f32.partialorder %v230_v21, %v501_v49  ;;  %vm234_vm12 = vcmp.le.f32.partialorder %v230_v21, %v501_v49  ;;  %vm223_vm13 = vcmp.lt.f32.partialorder %v222_v22, %v501_v49  ;;  %vm226_vm14 = vcmp.le.f32.partialorder %v222_v22, %v501_v49 }
 0x22b   :  { %v341_v0 = vsel %vm231_vm11, 1.0, %v407_v38  ;;  %v342_v1 = vsel %vm234_vm12, 1.0, %v407_v38  ;;  %v339_v2 = vsel %vm223_vm13, 1.0, %v407_v38  ;;  %v340_v29 = vsel %vm226_vm14, 1.0, %v407_v38 }
 0x22c   :  { %v266_v36 = vadd.f32 %v341_v0, %v339_v2  ;;  %v280_v37 = vadd.f32 %v342_v1, %v340_v29  ;;  %v272_v60 = vadd.f32 %v269_v41, %v268_v50  ;;  %v286_v61 = vadd.f32 %v283_v43, %v282_v51 }
 0x22d   :  { %v246_v30 = vpop.permute.xlu0 %245  ;;  %v238_v31 = vpop.permute.xlu1 %237  ;;  %vm299_vm11 = vcmask 0  }
 0x22e   :  { %vm247_vm1 = vcmp.lt.f32.partialorder %v246_v30, %v501_v49  ;;  %vm250_vm2 = vcmp.le.f32.partialorder %v246_v30, %v501_v49  ;;  %vm239_vm3 = vcmp.lt.f32.partialorder %v238_v31, %v501_v49  ;;  %vm242_vm4 = vcmp.le.f32.partialorder %v238_v31, %v501_v49 }
 0x22f   :  { %v345_v34 = vsel %vm247_vm1, 1.0, %v407_v38  ;;  %v346_v35 = vsel %vm250_vm2, 1.0, %v407_v38  ;;  %v343_v39 = vsel %vm239_vm3, 1.0, %v407_v38  ;;  %v344_v40 = vsel %vm242_vm4, 1.0, %v407_v38 }
 0x230   :  { %v267_v47 = vadd.f32 %v345_v34, %v343_v39  ;;  %v281_v48 = vadd.f32 %v346_v35, %v344_v40  ;;  %v270_v54 = vadd.f32 %v266_v36, %v265_v44  ;;  %v284_v55 = vadd.f32 %v280_v37, %v279_v45 }
 0x231   :  { %v254_v46 = vpop.permute.xlu1 %253 }
 0x232   :  { %vm255_vm5 = vcmp.lt.f32.partialorder %v254_v46, %v501_v49  ;;  %vm258_vm6 = vcmp.le.f32.partialorder %v254_v46, %v501_v49 }
 0x233   :  { %v347_v52 = vsel %vm255_vm5, 1.0, %v407_v38  ;;  %v348_v53 = vsel %vm258_vm6, 1.0, %v407_v38 }
 0x234   :  { %v271_v56 = vadd.f32 %v347_v52, %v267_v47  ;;  %v285_v57 = vadd.f32 %v348_v53, %v281_v48 }
 0x236   :  { %v273_v58 = vadd.f32 %v271_v56, %v270_v54  ;;  %v287_v59 = vadd.f32 %v285_v57, %v284_v55 }
 0x238   :  { %v274_v62 = vadd.f32 %v273_v58, %v272_v60  ;;  %v288_v63 = vadd.f32 %v287_v59, %v286_v61 }
 0x23a   :  { %vm289_vm8 = vcmp.le.f32.partialorder %v274_v62, 7.0  ;;  %vm290_vm9 = vcmp.ge.f32.partialorder %v288_v63, 7.0 }
 0x23b   :  { %vm291_vm10 = vmand %vm289_vm8, %vm290_vm9 }
 0x23c   :  { %v292_v38 = vsel %vm291_vm10, %v501_v49, -3e+38 }
 0x23d   :  { %v293_v5 = vsel %vm118_vm7, %v292_v38, -inf }
 0x23e   :  { %294 = vmax.xlane.f32.xlu0 %v293_v5 }
 0x242   :  { %120 = vadd.xlane.f32.xlu0 %v119_v6 }
 0x270   :  { %v124_v8 = vpop.xlane.xlu1 %123 }
 0x2cb   :  { %v295_v7 = vpop.xlane.xlu0 %294 }
 0x2cc   :  { %v296_v9 = vmul.f32 0.5, %v295_v7 }
 0x2ce   :  { %v297_v10 = vmul.f32 %v296_v9, %v124_v8 }
 0x2cf   :  { %v121_v11 = vpop.xlane.xlu0 %120 }
 0x2d0   :  { %v298_v12 = vadd.f32 %v297_v10, %v121_v11 }
 0x2d2   :  { %300 = vst.msk [vmem:[#allocation2] sm:$0x1] %vm299_vm11, %v298_v12 }
 0x2d3   :  { %393 = shalt.err (!%p390_p4)
}
 0x2d4   :  { %s394_s3 = scalar_lea.hbm %s602_s1, 16 }
 0x2d5   :  { %p395_p5 = scmp.ne.s32.totalorder %s602_s1, %s394_s3  ;;  %p398_p6 = scmp.lt.u32.totalorder %s394_s3, %s602_s1 }
 0x2d7   :  { %p400_p7 = pnand %p398_p6, %p395_p5 }
 0x2d9   :  { %403 = shalt.err (!%p400_p7)
}
 0x2da   :  { %310 = dma.vmem_to_hbm [thread:$0]  %s308_s28, 16, %s602_s1, [#allocation3]  }
 0x2db   :  { %404 = dma.done.wait [#allocation3], 16  }
 0x2dc   :  { %405 = vsyncadd [#allocation3], 4294967280 }
 0x2dd   :  { %314 = vsyncpa [#allocation3], 1 }

</bundles_post_ra>
